<compile_context>
chip_gen: v6e
topology: v6e:2x2x1
jax: 0.10.0
libtpu: 0.0.40
codegen_flags: <defaults>
</compile_context>

<pallas_src>
import jax
import jax.numpy as jnp
from jax.experimental import pallas as pl
from jax.experimental.pallas import tpu as pltpu


def _round_up(x, m):
    return (x + m - 1) // m * m


def dnn_kernel(x_ref, *refs):
    """refs = (w1, b1, w2, b2, ..., wL, bL, out_ref).

    Weights are host-pre-transposed to (in_pad, out_pad) bf16 so every layer is
    a canonical (M,K)x(K,N) MXU matmul with f32 accumulation; bias-add + ReLU
    run in f32 on the VPU.
    """
    out_ref = refs[-1]
    param_refs = refs[:-1]
    n_layers = len(param_refs) // 2

    h = x_ref[...]                                    # bf16 (TILE_B, in_pad)
    for li in range(n_layers):
        w = param_refs[2 * li][...]                   # bf16 (in_pad, out_pad)
        b = param_refs[2 * li + 1][...]               # f32  (1, out_pad)
        acc = jnp.dot(h, w, preferred_element_type=jnp.float32)
        act = jnp.maximum(acc + b, 0.0)               # f32 bias + ReLU (VPU)
        h = act.astype(jnp.bfloat16) if li < n_layers - 1 else act
    # Dropout in eval/inference mode == identity.
    out_ref[...] = h.astype(out_ref.dtype)


def _vmem_budget_bytes():
    """Generation-aware VMEM budget (v5e/v6e: 128 MiB, v7x: 64 MiB per TC)."""
    try:
        cap = int(pltpu.get_tpu_info().vmem_capacity_bytes)
    except Exception:
        cap = 64 << 20  # conservative fallback (v7x per-TC VMEM)
    budget = min(int(cap * 0.70), 96 << 20)
    limit = min(int(cap * 0.80), 110 << 20)
    return budget, limit


def dnn_forward(x, params, *, tile_b=1024, out_dtype=jnp.float32):
    """x: (B, in_dim) f32.  params: list of (W, b) with W=(out,in), b=(1,out)."""
    B, in_dim = x.shape
    dims = [in_dim] + [w.shape[0] for w, _ in params]
    assert params[0][0].shape[1] == in_dim

    # Lane-dense padding: all feature dims -> multiples of 128.
    dims_p = [_round_up(d, 128) for d in dims]
    in_p, out_p_dim = dims_p[0], dims_p[-1]
    max_dim = max(dims_p)
    out_itemsize = jnp.asarray(0, out_dtype).dtype.itemsize

    vmem_budget, vmem_limit = _vmem_budget_bytes()

    # bf16 activation tiles -> batch-tile granularity of 16 sublanes.
    gran = 16
    b_round = _round_up(B, gran)
    tile_b = min(_round_up(max(tile_b, gran), gran), b_round)

    # Resident params (conservatively budgeted as double-buffered even though
    # the constant index_maps fetch them once; pl.Buffered(1) below removes the
    # second buffer when supported).
    weight_bytes = 2 * sum(dims_p[i] * dims_p[i + 1] * 2 + dims_p[i + 1] * 4
                           for i in range(len(params)))
    n_x_buf = 3  # triple-buffered x stream (pl.Buffered(3)) when supported
    while True:
        stream_bytes = (n_x_buf * tile_b * in_p * 2          # bf16 x tiles
                        + 2 * tile_b * out_p_dim * out_itemsize)
        act_bytes = 3 * tile_b * max_dim * 4                  # live activations
        if weight_bytes + stream_bytes + act_bytes <= vmem_budget or tile_b <= gran:
            break
        tile_b = max(gran, _round_up(tile_b // 2, gran))

    # Guarantee >=2 grid steps for large batches so ("parallel",) actually
    # shards work across v7x's 2 TensorCores (negligible effect on v5e/v6e).
    half = _round_up((b_round + 1) // 2, gran)
    tile_b = min(tile_b, max(gran, half))

    b_pad = _round_up(B, tile_b)
    grid = (b_pad // tile_b,)

    # Host-side zero padding + weight pre-transpose (layout plumbing only).
    x_p = jnp.zeros((b_pad, in_p), jnp.bfloat16).at[:B, :in_dim].set(
        x.astype(jnp.bfloat16))
    flat_args = [x_p]
    param_shapes = []
    for li, (w, b) in enumerate(params):
        o, f = w.shape
        fp, op = dims_p[li], dims_p[li + 1]
        w_p = jnp.zeros((fp, op), jnp.bfloat16).at[:f, :o].set(
            w.T.astype(jnp.bfloat16))                 # (in_pad, out_pad) bf16
        b_p = jnp.zeros((1, op), jnp.float32).at[:, :o].set(b.reshape(1, o))
        flat_args += [w_p, b_p]
        param_shapes.append((fp, op))

    def build_specs(use_buffered):
        if use_buffered:
            specs = [pl.BlockSpec((tile_b, in_p), lambda i: (i, 0),
                                  pipeline_mode=pl.Buffered(n_x_buf))]
        else:
            specs = [pl.BlockSpec((tile_b, in_p), lambda i: (i, 0))]
        for fp, op in param_shapes:
            if use_buffered:
                specs += [pl.BlockSpec((fp, op), lambda i: (0, 0),
                                       pipeline_mode=pl.Buffered(1)),
                          pl.BlockSpec((1, op), lambda i: (0, 0),
                                       pipeline_mode=pl.Buffered(1))]
            else:
                specs += [pl.BlockSpec((fp, op), lambda i: (0, 0)),
                          pl.BlockSpec((1, op), lambda i: (0, 0))]
        return specs

    flops = 2 * b_pad * sum(dims_p[i] * dims_p[i + 1] for i in range(len(params)))
    bytes_accessed = (b_pad * in_p * 2
                      + sum(fp * op * 2 + op * 4 for fp, op in param_shapes)
                      + b_pad * out_p_dim * out_itemsize)
    cost = pl.CostEstimate(flops=flops, transcendentals=0,
                           bytes_accessed=bytes_accessed)

    def run(use_buffered):
        call = pl.pallas_call(
            dnn_kernel,
            out_shape=jax.ShapeDtypeStruct((b_pad, out_p_dim), out_dtype),
            grid=grid,
            in_specs=build_specs(use_buffered),
            out_specs=pl.BlockSpec((tile_b, out_p_dim), lambda i: (i, 0)),
            compiler_params=pltpu.CompilerParams(
                dimension_semantics=("parallel",),   # shard batch steps (v7x)
                vmem_limit_bytes=vmem_limit,
            ),
            cost_estimate=cost,
        )
        return call(*flat_args)

    out_padded = None
    if hasattr(pl, "Buffered"):
        try:
            out_padded = jax.block_until_ready(run(True))
        except Exception:
            out_padded = None  # fall back to default double-buffering
    if out_padded is None:
        out_padded = run(False)

    return out_padded[:B, :dims[-1]].astype(jnp.float32)


def init_params(key, hidden_units):
    """Deterministic init matching nn.Linear(layer_in, layer_out) shapes/ranges."""
    params = []
    for fan_in, fan_out in zip(hidden_units[:-1], hidden_units[1:]):
        key, kw, kb = jax.random.split(key, 3)
        bound = 1.0 / jnp.sqrt(jnp.float32(fan_in))
        w = jax.random.uniform(kw, (fan_out, fan_in), jnp.float32, -bound, bound)
        b = jax.random.uniform(kb, (1, fan_out), jnp.float32, -bound, bound)
        params.append((w, b))
    return params


def dnn_reference(x, params, *, bf16_inputs=False):
    """Plain-JAX reference of the PyTorch forward (dropout in eval mode).

    bf16_inputs=True mirrors the kernel numerics (bf16 operands, f32 accum).
    """
    h = x
    for w, b in params:
        if bf16_inputs:
            hh = h.astype(jnp.bfloat16).astype(jnp.float32)
            ww = w.astype(jnp.bfloat16).astype(jnp.float32)
        else:
            hh, ww = h, w
        h = jnp.maximum(hh @ ww.T + b, 0.0)
    return h


if __name__ == "__main__":
    hidden_units = [32, 64, 32, 16]   # DNN(hidden_units=[32,64,32,16], drop_out=0.5)

    key = jax.random.PRNGKey(0)
    key, kx1, kx2 = jax.random.split(key, 3)
    params = init_params(key, hidden_units)

    # Case 1: whole batch in one tile.
    x1 = jax.random.normal(kx1, (16, hidden_units[0]), jnp.float32)
    out1 = jax.block_until_ready(dnn_forward(x1, params))

    # Case 2: multi-step batch grid (exercises pipelining + padded-batch slice).
    x2 = jax.random.normal(kx2, (40, hidden_units[0]), jnp.float32)
    out2 = jax.block_until_ready(dnn_forward(x2, params, tile_b=16))

    for x, out in ((x1, out1), (x2, out2)):
        assert out.shape == (x.shape[0], hidden_units[-1])
        ref_bf16 = dnn_reference(x, params, bf16_inputs=True)
        ref_f32 = dnn_reference(x, params, bf16_inputs=False)
        assert jnp.allclose(out, ref_bf16, atol=5e-3, rtol=5e-3), \
            "mismatch vs bf16-aware reference"
        assert jnp.allclose(out, ref_f32, atol=1e-1, rtol=1e-1), \
            "mismatch vs f32 reference"

    print("KERNEL_OK")
</pallas_src>

<mosaic_0001>
module attributes {stable_mosaic.version = 11 : i64} {
  func.func @dnn_kernel(%arg0: i32, %arg1: memref<16x128xbf16, #tpu.memory_space<vmem>>, %arg2: memref<128x128xbf16, #tpu.memory_space<vmem>>, %arg3: memref<1x128xf32, #tpu.memory_space<vmem>>, %arg4: memref<128x128xbf16, #tpu.memory_space<vmem>>, %arg5: memref<1x128xf32, #tpu.memory_space<vmem>>, %arg6: memref<128x128xbf16, #tpu.memory_space<vmem>>, %arg7: memref<1x128xf32, #tpu.memory_space<vmem>>, %arg8: memref<16x128xf32, #tpu.memory_space<vmem>>) attributes {dimension_semantics = [#tpu.dimension_semantics<parallel>], iteration_bounds = array<i64: 1>, scalar_prefetch = 0 : i64, scratch_operands = 0 : i64, tpu.core_type = #tpu.core_type<tc>, window_params = [{transform_indices = @transform_0, window_bounds = array<i64: 16, 128>}, {pipeline_mode = #tpu.pipeline_mode<synchronous>, transform_indices = @transform_1, window_bounds = array<i64: 128, 128>}, {pipeline_mode = #tpu.pipeline_mode<synchronous>, transform_indices = @transform_2, window_bounds = array<i64: 1, 128>}, {pipeline_mode = #tpu.pipeline_mode<synchronous>, transform_indices = @transform_3, window_bounds = array<i64: 128, 128>}, {pipeline_mode = #tpu.pipeline_mode<synchronous>, transform_indices = @transform_4, window_bounds = array<i64: 1, 128>}, {pipeline_mode = #tpu.pipeline_mode<synchronous>, transform_indices = @transform_5, window_bounds = array<i64: 128, 128>}, {pipeline_mode = #tpu.pipeline_mode<synchronous>, transform_indices = @transform_6, window_bounds = array<i64: 1, 128>}, {transform_indices = @transform_7, window_bounds = array<i64: 16, 128>}]} {
    %c0 = arith.constant 0 : index
    %c0_0 = arith.constant 0 : index
    %0 = vector.load %arg1[%c0, %c0_0] : memref<16x128xbf16, #tpu.memory_space<vmem>>, vector<16x128xbf16>
    %c0_1 = arith.constant 0 : index
    %c0_2 = arith.constant 0 : index
    %1 = vector.load %arg2[%c0_1, %c0_2] : memref<128x128xbf16, #tpu.memory_space<vmem>>, vector<128x128xbf16>
    %c0_3 = arith.constant 0 : index
    %c0_4 = arith.constant 0 : index
    %2 = vector.load %arg3[%c0_3, %c0_4] : memref<1x128xf32, #tpu.memory_space<vmem>>, vector<1x128xf32>
    %cst = arith.constant dense<0.000000e+00> : vector<16x128xf32>
    %3 = tpu.matmul %0, %1, %cst {dimension_numbers = #tpu.dot_dimension_numbers<[1], [0], [0], [1], [0, 0, 1, 1], [], []>} : vector<16x128xbf16>, vector<128x128xbf16>, vector<16x128xf32> -> vector<16x128xf32>
    %4 = vector.broadcast %2 : vector<1x128xf32> to vector<16x128xf32>
    %5 = arith.addf %3, %4 : vector<16x128xf32>
    %cst_5 = arith.constant 0.000000e+00 : f32
    %6 = vector.broadcast %cst_5 : f32 to vector<16x128xf32>
    %7 = arith.maximumf %5, %6 : vector<16x128xf32>
    %8 = arith.truncf %7 : vector<16x128xf32> to vector<16x128xbf16>
    %c0_6 = arith.constant 0 : index
    %c0_7 = arith.constant 0 : index
    %9 = vector.load %arg4[%c0_6, %c0_7] : memref<128x128xbf16, #tpu.memory_space<vmem>>, vector<128x128xbf16>
    %c0_8 = arith.constant 0 : index
    %c0_9 = arith.constant 0 : index
    %10 = vector.load %arg5[%c0_8, %c0_9] : memref<1x128xf32, #tpu.memory_space<vmem>>, vector<1x128xf32>
    %cst_10 = arith.constant dense<0.000000e+00> : vector<16x128xf32>
    %11 = tpu.matmul %8, %9, %cst_10 {dimension_numbers = #tpu.dot_dimension_numbers<[1], [0], [0], [1], [0, 0, 1, 1], [], []>} : vector<16x128xbf16>, vector<128x128xbf16>, vector<16x128xf32> -> vector<16x128xf32>
    %12 = vector.broadcast %10 : vector<1x128xf32> to vector<16x128xf32>
    %13 = arith.addf %11, %12 : vector<16x128xf32>
    %cst_11 = arith.constant 0.000000e+00 : f32
    %14 = vector.broadcast %cst_11 : f32 to vector<16x128xf32>
    %15 = arith.maximumf %13, %14 : vector<16x128xf32>
    %16 = arith.truncf %15 : vector<16x128xf32> to vector<16x128xbf16>
    %c0_12 = arith.constant 0 : index
    %c0_13 = arith.constant 0 : index
    %17 = vector.load %arg6[%c0_12, %c0_13] : memref<128x128xbf16, #tpu.memory_space<vmem>>, vector<128x128xbf16>
    %c0_14 = arith.constant 0 : index
    %c0_15 = arith.constant 0 : index
    %18 = vector.load %arg7[%c0_14, %c0_15] : memref<1x128xf32, #tpu.memory_space<vmem>>, vector<1x128xf32>
    %cst_16 = arith.constant dense<0.000000e+00> : vector<16x128xf32>
    %19 = tpu.matmul %16, %17, %cst_16 {dimension_numbers = #tpu.dot_dimension_numbers<[1], [0], [0], [1], [0, 0, 1, 1], [], []>} : vector<16x128xbf16>, vector<128x128xbf16>, vector<16x128xf32> -> vector<16x128xf32>
    %20 = vector.broadcast %18 : vector<1x128xf32> to vector<16x128xf32>
    %21 = arith.addf %19, %20 : vector<16x128xf32>
    %cst_17 = arith.constant 0.000000e+00 : f32
    %22 = vector.broadcast %cst_17 : f32 to vector<16x128xf32>
    %23 = arith.maximumf %21, %22 : vector<16x128xf32>
    %c0_18 = arith.constant 0 : index
    %c0_19 = arith.constant 0 : index
    %24 = vector.load %arg8[%c0_18, %c0_19] : memref<16x128xf32, #tpu.memory_space<vmem>>, vector<16x128xf32>
    tpu.vector_store %arg8[%c0_18, %c0_19], %23 {strides = array<i32>} : memref<16x128xf32, #tpu.memory_space<vmem>>, vector<16x128xf32>,
    return
  }
  func.func @transform_0(%arg0: i32) -> (i32, i32) {
    %c0_i32 = arith.constant 0 : i32
    %c0_i32_0 = arith.constant 0 : i32
    return %arg0, %c0_i32 : i32, i32
  }
  func.func @transform_1(%arg0: i32) -> (i32, i32) {
    %c0_i32 = arith.constant 0 : i32
    %c0_i32_0 = arith.constant 0 : i32
    %c0_i32_1 = arith.constant 0 : i32
    return %c0_i32, %c0_i32_0 : i32, i32
  }
  func.func @transform_2(%arg0: i32) -> (i32, i32) {
    %c0_i32 = arith.constant 0 : i32
    %c0_i32_0 = arith.constant 0 : i32
    %c0_i32_1 = arith.constant 0 : i32
    return %c0_i32, %c0_i32_0 : i32, i32
  }
  func.func @transform_3(%arg0: i32) -> (i32, i32) {
    %c0_i32 = arith.constant 0 : i32
    %c0_i32_0 = arith.constant 0 : i32
    %c0_i32_1 = arith.constant 0 : i32
    return %c0_i32, %c0_i32_0 : i32, i32
  }
  func.func @transform_4(%arg0: i32) -> (i32, i32) {
    %c0_i32 = arith.constant 0 : i32
    %c0_i32_0 = arith.constant 0 : i32
    %c0_i32_1 = arith.constant 0 : i32
    return %c0_i32, %c0_i32_0 : i32, i32
  }
  func.func @transform_5(%arg0: i32) -> (i32, i32) {
    %c0_i32 = arith.constant 0 : i32
    %c0_i32_0 = arith.constant 0 : i32
    %c0_i32_1 = arith.constant 0 : i32
    return %c0_i32, %c0_i32_0 : i32, i32
  }
  func.func @transform_6(%arg0: i32) -> (i32, i32) {
    %c0_i32 = arith.constant 0 : i32
    %c0_i32_0 = arith.constant 0 : i32
    %c0_i32_1 = arith.constant 0 : i32
    return %c0_i32, %c0_i32_0 : i32, i32
  }
  func.func @transform_7(%arg0: i32) -> (i32, i32) {
    %c0_i32 = arith.constant 0 : i32
    %c0_i32_0 = arith.constant 0 : i32
    return %arg0, %c0_i32 : i32, i32
  }
}

</mosaic_0001>

<bundles_post_ra>
// kernel: tpu_custom_call.1
= control target key start
LH: loop header
LB: loop body
LE: loop exit
PB: predicated region body
PF: predicated region fallthrough
CT: control target
= control target key end

     0   :  { %12 = vsyncpa [#allocation3], 0  ;;  %s832_s0 = inlined_call_operand.hbm [shape: bf16[16,128], index: 0, kind: input, shape index: {}]   ;;  %s833_s1 = inlined_call_operand.hbm [shape: bf16[128,128], index: 1, kind: input, shape index: {}]   ;;  %s834_s2 = inlined_call_operand.vmem [shape: f32[1,128], index: 2, kind: input, shape index: {}]   ;;  %s835_s3 = inlined_call_operand.hbm [shape: bf16[128,128], index: 3, kind: input, shape index: {}]   ;;  %s836_s4 = inlined_call_operand.vmem [shape: f32[1,128], index: 4, kind: input, shape index: {}]   ;;  %s837_s5 = inlined_call_operand.hbm [shape: bf16[128,128], index: 5, kind: input, shape index: {}]   ;;  %s838_s6 = inlined_call_operand.vmem [shape: f32[1,128], index: 6, kind: input, shape index: {}]   ;;  %s839_s7 = inlined_call_operand.hbm [shape: f32[16,128], index: 7, kind: output, shape index: {}]  }
   0x1   :  { %13 = vsyncpa [#allocation6], 0 }
   0x2   :  { %14 = vsyncpa [#allocation9], 0 }
   0x3   :  { %15 = vsyncpa [#allocation4], 0  ;;  %s715_s24 = smov [#allocation5]   ;;  %s716_s26 = smov [#allocation2]  }
   0x4   :  { %s33_s25 = sshll.u32 %s715_s24, 4  ;;  %s21_s27 = sshll.u32 %s716_s26, 4  ;;  %s34_s25 = int_to_ptr.vmem [resolvable:$true] %s33_s25  ;;  %s22_s27 = int_to_ptr.vmem [resolvable:$true] %s21_s27 }
   0x5   :  { %s615_s28 = scalar_lea.vmem %s34_s25, 1024  ;;  %p620_p1 = scmp.lt.s32.totalorder %s34_s25, %s34_s25 }
   0x6   :  { %p616_p0 = scmp.ne.s32.totalorder %s34_s25, %s615_s28  ;;  %p621_p2 = scmp.lt.s32.totalorder %s615_s28, %s615_s28 }
   0x8   :  { %p622_p3 = por %p621_p2, %p620_p1 }
   0xa   :  { %p623_p4 = pnand %p622_p3, %p616_p0 }
   0xc   :  { %626 = shalt.err (!%p623_p4)
}
   0xd   :  { %s717_s29 = smov 64   ;;  %s718_s30 = smov 4  }
   0xe   :  { %39 = dma.hbm_to_vmem [thread:$0]  %s833_s1, 1024, %s34_s25, [#allocation6], %s717_s29, %s717_s29, %s718_s30  }
   0xf   :  { %s635_s10 = scalar_lea.vmem %s22_s27, 128  ;;  %p640_p6 = scmp.lt.s32.totalorder %s22_s27, %s22_s27 }
  0x10   :  { %p636_p5 = scmp.ne.s32.totalorder %s22_s27, %s635_s10  ;;  %p641_p7 = scmp.lt.s32.totalorder %s635_s10, %s635_s10 }
  0x12   :  { %p642_p8 = por %p641_p7, %p640_p6 }
  0x14   :  { %p643_p9 = pnand %p642_p8, %p636_p5 }
  0x16   :  { %646 = shalt.err (!%p643_p9)
}
  0x17   :  { %27 = dma.hbm_to_vmem [thread:$0]  %s832_s0, 128, %s22_s27, [#allocation3], %s717_s29, %s717_s29, %s718_s30  }
  0x18   :  { %s719_s13 = smov [#allocation7]   ;;  %s720_s15 = smov [#allocation8]  }
  0x19   :  { %s47_s14 = sshll.u32 %s719_s13, 4  ;;  %s61_s16 = sshll.u32 %s720_s15, 4  ;;  %s48_s14 = int_to_ptr.vmem [resolvable:$true] %s47_s14  ;;  %s62_s16 = int_to_ptr.vmem [resolvable:$true] %s61_s16 }
  0x1a   :  { %s655_s1 = scalar_lea.vmem %s48_s14, 1024  ;;  %p660_p11 = scmp.lt.s32.totalorder %s48_s14, %s48_s14 }
  0x1b   :  { %p656_p10 = scmp.ne.s32.totalorder %s48_s14, %s655_s1  ;;  %p661_p12 = scmp.lt.s32.totalorder %s655_s1, %s655_s1 }
  0x1d   :  { %p662_p13 = por %p661_p12, %p660_p11 }
  0x1f   :  { %p663_p0 = pnand %p662_p13, %p656_p10 }
  0x21   :  { %666 = shalt.err (!%p663_p0)
}
  0x22   :  { %53 = dma.hbm_to_vmem [thread:$0]  %s835_s3, 1024, %s48_s14, [#allocation6], %s717_s29, %s717_s29, %s718_s30  }
  0x23   :  { %s675_s0 = scalar_lea.vmem %s62_s16, 1024  ;;  %p680_p2 = scmp.lt.s32.totalorder %s62_s16, %s62_s16 }
  0x24   :  { %p676_p1 = scmp.ne.s32.totalorder %s62_s16, %s675_s0  ;;  %p681_p3 = scmp.lt.s32.totalorder %s675_s0, %s675_s0 }
  0x26   :  { %p682_p4 = por %p681_p3, %p680_p2 }
  0x28   :  { %p683_p5 = pnand %p682_p4, %p676_p1 }
  0x2a   :  { %686 = shalt.err (!%p683_p5)
}
  0x2b   :  { %67 = dma.hbm_to_vmem [thread:$0]  %s837_s5, 1024, %s62_s16, [#allocation9], %s717_s29, %s717_s29, %s718_s30  }
  0x2c   :  { %707 = dma.done.wait [#allocation3], 128  }
  0x2d   :  { %708 = vsyncadd [#allocation3], 4294967168 }
  0x2e   :  { %709 = dma.done.wait [#allocation6], 2048  }
  0x2f   :  { %710 = vsyncadd [#allocation6], 4294965248 }
  0x30   :  { %711 = dma.done.wait [#allocation9], 1024  }
  0x31   :  { %712 = vsyncadd [#allocation9], 4294966272  ;;  %v721_v0 = vmov 0.0   ;;  %vm722_vm0 = vmmov 0   ;;  %v582_v1 = vld [vmem:[#allocation5 + $0x38] sm:$0xff]   ;;  %v583_v2 = vld [vmem:[#allocation5 + $0x30] sm:$0xff]  }
  0x32   :  { %511 = vmatprep.subr.bf16.mxu0 %v721_v0  ;;  %527 = vmatprep.mubr.msk.bf16.mxu0 %vm722_vm0, %v721_v0  ;;  %v584_v3 = vld [vmem:[#allocation5 + $0x28] sm:$0xff]   ;;  %v591_v4 = vld [vmem:[#allocation7 + $0x38] sm:$0xff]   ;;  %v585_v5 = vld [vmem:[#allocation5 + $0x20] sm:$0xff]   ;;  %s723_s24 = smov [#allocation10]  }
  0x33   :  { %531 = vmatprep.subr.bf16.mxu1 %v721_v0  ;;  %547 = vmatprep.mubr.msk.bf16.mxu1 %vm722_vm0, %v721_v0  ;;  %v592_v6 = vld [vmem:[#allocation7 + $0x30] sm:$0xff]   ;;  %v586_v7 = vld [vmem:[#allocation5 + $0x18] sm:$0xff]   ;;  %v593_v8 = vld [vmem:[#allocation7 + $0x28] sm:$0xff]  }
  0x34   :  { %512 = vmatpush3.bf16.msra.mxu0 %v582_v1  ;;  %532 = vmatpush3.bf16.msra.mxu1 %v591_v4  ;;  %v587_v9 = vld [vmem:[#allocation5 + $0x10] sm:$0xff]   ;;  %v594_v10 = vld [vmem:[#allocation7 + $0x20] sm:$0xff]   ;;  %v588_v11 = vld [vmem:[#allocation5 + $0x8] sm:$0xff]  }
  0x35   :  { %513 = vmatprep.subr.bf16.mxu0 %v721_v0  ;;  %533 = vmatprep.subr.bf16.mxu1 %v721_v0  ;;  %v595_v12 = vld [vmem:[#allocation7 + $0x18] sm:$0xff]   ;;  %v589_v13 = vld [vmem:[#allocation5] sm:$0xff]   ;;  %v596_v15 = vld [vmem:[#allocation7 + $0x10] sm:$0xff]  }
  0x36   :  { %v590_v14 = vld [vmem:[#allocation2] sm:$0xff]   ;;  %v597_v16 = vld [vmem:[#allocation7 + $0x8] sm:$0xff]   ;;  %v598_v17 = vld [vmem:[#allocation7] sm:$0xff]  }
  0x37   :  { %v599_v18 = vld [vmem:[#allocation8 + $0x38] sm:$0xff]   ;;  %v600_v19 = vld [vmem:[#allocation8 + $0x30] sm:$0xff]   ;;  %v601_v20 = vld [vmem:[#allocation8 + $0x28] sm:$0xff]  }
  0x38   :  { %514 = vmatpush3.bf16.msra.mxu0 %v583_v2  ;;  %534 = vmatpush3.bf16.msra.mxu1 %v592_v6  ;;  %v602_v21 = vld [vmem:[#allocation8 + $0x20] sm:$0xff]   ;;  %v603_v22 = vld [vmem:[#allocation8 + $0x18] sm:$0xff]   ;;  %v604_v33 = vld [vmem:[#allocation8 + $0x10] sm:$0xff]  }
  0x39   :  { %515 = vmatprep.subr.bf16.mxu0 %v721_v0  ;;  %535 = vmatprep.subr.bf16.mxu1 %v721_v0  ;;  %v456_v23 = vld [vmem:[%s834_s2] ss:$0 sm:$0xff]  ;;  %v605_v34 = vld [vmem:[#allocation8 + $0x8] sm:$0xff]   ;;  %v606_v35 = vld [vmem:[#allocation8] sm:$0xff]  }
  0x3a   :  { %v466_v36 = vld [vmem:[%s836_s4] ss:$0 sm:$0xff]  ;;  %s442_s4 = sshll.u32 %s723_s24, 4  ;;  %s443_s4 = int_to_ptr.vmem [resolvable:$true] %s442_s4 }
  0x3b   :  { %v475_v46 = vld [vmem:[%s838_s6] ss:$0 sm:$0xff]  ;;  %s687_s25 = scalar_lea.vmem %s443_s4, 256  ;;  %p692_p7 = scmp.lt.s32.totalorder %s443_s4, %s443_s4 }
  0x3c   :  { %516 = vmatpush3.bf16.msra.mxu0 %v584_v3  ;;  %536 = vmatpush3.bf16.msra.mxu1 %v593_v8  ;;  %p688_p6 = scmp.ne.s32.totalorder %s443_s4, %s687_s25  ;;  %p693_p8 = scmp.lt.s32.totalorder %s687_s25, %s687_s25 }
  0x3d   :  { %517 = vmatprep.subr.bf16.mxu0 %v721_v0  ;;  %537 = vmatprep.subr.bf16.mxu1 %v721_v0 }
  0x3e   :  { %p694_p9 = por %p693_p8, %p692_p7 }
  0x40   :  { %518 = vmatpush3.bf16.msra.mxu0 %v585_v5  ;;  %538 = vmatpush3.bf16.msra.mxu1 %v594_v10  ;;  %p695_p10 = pnand %p694_p9, %p688_p6 }
  0x41   :  { %519 = vmatprep.subr.bf16.mxu0 %v721_v0  ;;  %539 = vmatprep.subr.bf16.mxu1 %v721_v0 }
  0x44   :  { %520 = vmatpush3.bf16.msra.mxu0 %v586_v7  ;;  %540 = vmatpush3.bf16.msra.mxu1 %v595_v12 }
  0x45   :  { %521 = vmatprep.subr.bf16.mxu0 %v721_v0  ;;  %541 = vmatprep.subr.bf16.mxu1 %v721_v0 }
  0x48   :  { %522 = vmatpush3.bf16.msra.mxu0 %v587_v9  ;;  %542 = vmatpush3.bf16.msra.mxu1 %v596_v15 }
  0x49   :  { %523 = vmatprep.subr.bf16.mxu0 %v721_v0  ;;  %543 = vmatprep.subr.bf16.mxu1 %v721_v0 }
  0x4c   :  { %524 = vmatpush3.bf16.msra.mxu0 %v588_v11  ;;  %544 = vmatpush3.bf16.msra.mxu1 %v597_v16 }
  0x4d   :  { %525 = vmatprep.subr.bf16.mxu0 %v721_v0  ;;  %545 = vmatprep.subr.bf16.mxu1 %v721_v0 }
  0x50   :  { %526 = vmatpush3.bf16.msra.mxu0 %v589_v13  ;;  %546 = vmatpush3.bf16.msra.mxu1 %v598_v17 }
  0x51   :  { %551 = vmatprep.subr.bf16.mxu0 %v721_v0 }
  0x53   :  { %528 = vmatmul.mubr.bf16.vlgmr.msra.gmra.mxu0 %v590_v14 }
  0x54   :  { %567 = vmatprep.mubr.msk.bf16.mxu0 %vm722_vm0, %v721_v0  ;;  %552 = vmatpush3.bf16.msra.mxu0 %v599_v18 }
  0x55   :  { %553 = vmatprep.subr.bf16.mxu0 %v721_v0 }
  0x58   :  { %554 = vmatpush3.bf16.msra.mxu0 %v600_v19 }
  0x59   :  { %555 = vmatprep.subr.bf16.mxu0 %v721_v0 }
  0x5c   :  { %556 = vmatpush3.bf16.msra.mxu0 %v601_v20 }
  0x5d   :  { %557 = vmatprep.subr.bf16.mxu0 %v721_v0 }
  0x60   :  { %558 = vmatpush3.bf16.msra.mxu0 %v602_v21 }
  0x61   :  { %559 = vmatprep.subr.bf16.mxu0 %v721_v0 }
  0x64   :  { %560 = vmatpush3.bf16.msra.mxu0 %v603_v22 }
  0x65   :  { %561 = vmatprep.subr.bf16.mxu0 %v721_v0 }
  0x68   :  { %562 = vmatpush3.bf16.msra.mxu0 %v604_v33 }
  0x69   :  { %563 = vmatprep.subr.bf16.mxu0 %v721_v0 }
  0x6c   :  { %564 = vmatpush3.bf16.msra.mxu0 %v605_v34 }
  0x6d   :  { %565 = vmatprep.subr.bf16.mxu0 %v721_v0 }
  0x70   :  { %566 = vmatpush3.bf16.msra.mxu0 %v606_v35 }
 0x113   :  { %v196_v24 = vpop.f32.mrf.mxu0 }
 0x114   :  { %v197_v26 = vadd.f32 %v456_v23, %v196_v24 }
 0x115   :  { %v529_v25 = vpop.f32.mrf.mxu0 }
 0x116   :  { %v203_v30 = vmax.f32 %v197_v26, 0.0 }
 0x117   :  { %v199_v27 = vpop.f32.mrf.mxu0 }
 0x118   :  { %v200_v28 = vadd.f32 %v456_v23, %v199_v27 }
 0x119   :  { %v530_v29 = vpop.f32.mrf.mxu0 }
 0x11a   :  { %v204_v31 = vmax.f32 %v200_v28, 0.0 }
 0x11c   :  { %v205_v32 = vpack.c.bf16 %v204_v31, %v203_v30 }
 0x11e   :  { %548 = vmatmul.mubr.bf16.vlgmr.msra.gmra.mxu1 %v205_v32 }
 0x1de   :  { %v311_v37 = vpop.f32.mrf.mxu1 }
 0x1df   :  { %v312_v39 = vadd.f32 %v466_v36, %v311_v37 }
 0x1e0   :  { %v549_v38 = vpop.f32.mrf.mxu1 }
 0x1e1   :  { %v318_v43 = vmax.f32 %v312_v39, 0.0 }
 0x1e2   :  { %v314_v40 = vpop.f32.mrf.mxu1 }
 0x1e3   :  { %v315_v41 = vadd.f32 %v466_v36, %v314_v40 }
 0x1e4   :  { %v550_v42 = vpop.f32.mrf.mxu1 }
 0x1e5   :  { %v319_v44 = vmax.f32 %v315_v41, 0.0 }
 0x1e7   :  { %v320_v45 = vpack.c.bf16 %v319_v44, %v318_v43 }
 0x1e9   :  { %568 = vmatmul.mubr.bf16.vlgmr.msra.gmra.mxu0 %v320_v45 }
 0x2a9   :  { %v426_v47 = vpop.f32.mrf.mxu0 }
 0x2aa   :  { %v427_v48 = vadd.f32 %v475_v46, %v426_v47 }
 0x2ab   :  { %v569_v49 = vpop.f32.mrf.mxu0 }
 0x2ac   :  { %v433_v50 = vmax.f32 %v427_v48, 0.0 }
 0x2ad   :  { %v429_v51 = vpop.f32.mrf.mxu0 }
 0x2ae   :  { %435 = vst [vmem:[#allocation10] sm:$0xff] %v433_v50  ;;  %v430_v52 = vadd.f32 %v475_v46, %v429_v51 }
 0x2af   :  { %v570_v53 = vpop.f32.mrf.mxu0 }
 0x2b0   :  { %v434_v54 = vmax.f32 %v430_v52, 0.0 }
 0x2b2   :  { %436 = vst [vmem:[#allocation10 + $0x8] sm:$0xff] %v434_v54 }
 0x2b3   :  { %698 = shalt.err (!%p695_p10)
}
 0x2b4   :  { %s724_s6 = smov 128   ;;  %s725_s26 = smov 8  }
 0x2b5   :  { %448 = dma.vmem_to_hbm [thread:$0]  %s443_s4, 256, %s839_s7, [#allocation4], %s724_s6, %s724_s6, %s725_s26  }
 0x2b6   :  { %713 = dma.done.wait [#allocation4], 256  }
 0x2b7   :  { %714 = vsyncadd [#allocation4], 4294967040 }
 0x2b8   :  { %452 = vsyncpa [#allocation3], 1 }
 0x2b9   :  { %453 = vsyncpa [#allocation6], 1 }
 0x2ba   :  { %454 = vsyncpa [#allocation9], 1 }
 0x2bb   :  { %455 = vsyncpa [#allocation4], 1 }

</bundles_post_ra>
